<compile_context>
chip_gen: v5e
topology: v5e:2x2
jax: 0.10.0
libtpu: 0.0.40
codegen_flags: <defaults>
</compile_context>

<pallas_src>
import functools

import jax
import jax.numpy as jnp
from jax.experimental import pallas as pl
from jax.experimental.pallas import tpu as pltpu


def _round_up(x: int, m: int) -> int:
    return ((x + m - 1) // m) * m


def _rmsnorm_kernel(x_ref, w_ref, o_ref, *, eps: float, inv_hidden: float):
    # x_ref: (row_tile, H_pad), w_ref: (1, H_pad), o_ref: (row_tile, H_pad)
    x = x_ref[...].astype(jnp.float32)                       # x.float()
    # sum of squares / TRUE hidden  ==  mean over the unpadded hidden dim
    # (zero-padded lanes contribute 0 to the sum).
    ms = jnp.sum(x * x, axis=-1, keepdims=True) * inv_hidden
    inv = jax.lax.rsqrt(ms + eps)                            # torch.rsqrt(mean + eps)
    normed = (x * inv).astype(x_ref.dtype)                   # .type_as(x)
    o_ref[...] = (normed * w_ref[...]).astype(o_ref.dtype)   # * self.weight


def _pick_row_tile(rows: int, hidden_pad: int, io_dtype_size: int) -> int:
    """Largest multiple-of-8 row tile that fits the VMEM budget (capped at 1024)."""
    try:
        vmem_bytes = pltpu.get_tpu_info().vmem_capacity_bytes
    except Exception:
        vmem_bytes = 64 * 1024 * 1024  # most conservative across gens (v7x)
    budget = int(vmem_bytes * 0.4)     # leave headroom for compiler temps

    # Resident bytes per row: double-buffered input + output blocks (io dtype)
    # plus in-kernel f32 temporaries (x.astype(f32) and the x*inv product).
    bytes_per_row = hidden_pad * (2 * 2 * io_dtype_size + 2 * 4)
    row_tile = max(8, (budget // bytes_per_row) // 8 * 8)
    row_tile = min(row_tile, 1024)

    # For large inputs keep >= ~8 grid steps so the row axis can be sharded
    # across v7x's 2 TensorCores and still pipeline per core.
    if rows > 8 * 8:
        row_tile = min(row_tile, max(8, _round_up(pl.cdiv(rows, 8), 8)))

    # Never tile wider than the (padded) row count.
    row_tile = min(row_tile, _round_up(rows, 8))
    return row_tile


def rmsnorm(x: jax.Array, weight: jax.Array, eps: float = 1e-6) -> jax.Array:
    """RMSNorm over the last axis of x; weight has shape (hidden,)."""
    orig_shape = x.shape
    hidden = orig_shape[-1]
    assert weight.shape == (hidden,)

    rows = 1
    for d in orig_shape[:-1]:
        rows *= d
    x2d = x.reshape(rows, hidden)
    w2d = weight.reshape(1, hidden)

    # Lane-dense hidden: pad to a multiple of 128 (full vst instead of vst.msk).
    hidden_pad = max(128, _round_up(hidden, 128))
    io_dtype_size = jnp.dtype(x.dtype).itemsize

    row_tile = _pick_row_tile(rows, hidden_pad, io_dtype_size)
    rows_pad = _round_up(rows, row_tile)

    if hidden_pad != hidden or rows_pad != rows:
        x2d = jnp.pad(x2d, ((0, rows_pad - rows), (0, hidden_pad - hidden)))
    if hidden_pad != hidden:
        w2d = jnp.pad(w2d, ((0, 0), (0, hidden_pad - hidden)))

    grid = (rows_pad // row_tile,)

    # Explicit scoped-VMEM budget for the enlarged tiles:
    #   2x double-buffered (input + output) + f32 temporaries + weight + headroom.
    blk_io = row_tile * hidden_pad * io_dtype_size
    vmem_needed = (2 * 2 * blk_io
                   + 2 * row_tile * hidden_pad * 4
                   + 2 * hidden_pad * io_dtype_size)
    vmem_limit = int(min(max(vmem_needed + (4 << 20), 32 << 20), 128 << 20))

    out2d = pl.pallas_call(
        functools.partial(_rmsnorm_kernel, eps=eps, inv_hidden=1.0 / hidden),
        out_shape=jax.ShapeDtypeStruct((rows_pad, hidden_pad), x.dtype),
        grid_spec=pltpu.PrefetchScalarGridSpec(
            num_scalar_prefetch=0,
            grid=grid,
            in_specs=[
                pl.BlockSpec((row_tile, hidden_pad), lambda i: (i, 0)),
                # Weight: same block every step -> fetched once, stays resident.
                pl.BlockSpec((1, hidden_pad), lambda i: (0, 0)),
            ],
            out_specs=pl.BlockSpec((row_tile, hidden_pad), lambda i: (i, 0)),
        ),
        compiler_params=pltpu.CompilerParams(
            dimension_semantics=("parallel",),
            vmem_limit_bytes=vmem_limit,
        ),
    )(x2d, w2d)

    if hidden_pad != hidden or rows_pad != rows:
        out2d = out2d[:rows, :hidden]
    return out2d.reshape(orig_shape)


if __name__ == "__main__":
    key = jax.random.PRNGKey(0)
    batch, seq, hidden = 2, 8, 32

    x = jax.random.normal(key, (batch, seq, hidden), dtype=jnp.float32)
    # Parameter: initialized to ones, like nn.Parameter(torch.ones(hidden_dim))
    weight = jnp.ones((hidden,), dtype=jnp.float32)

    out = rmsnorm(x, weight, eps=1e-6)
    jax.block_until_ready(out)

    # Reference check (plain JAX) for sanity.
    xf = x.astype(jnp.float32)
    ref = xf * jax.lax.rsqrt(jnp.mean(xf * xf, axis=-1, keepdims=True) + 1e-6)
    ref = ref.astype(x.dtype) * weight
    assert out.shape == x.shape
    assert jnp.allclose(out, ref, atol=1e-5, rtol=1e-5)

    print("KERNEL_OK")
</pallas_src>

<mosaic_0001>
module attributes {stable_mosaic.version = 11 : i64} {
  func.func @_rmsnorm_kernel(%arg0: i32, %arg1: memref<16x128xf32, #tpu.memory_space<vmem>>, %arg2: memref<1x128xf32, #tpu.memory_space<vmem>>, %arg3: memref<16x128xf32, #tpu.memory_space<vmem>>) attributes {dimension_semantics = [#tpu.dimension_semantics<parallel>], iteration_bounds = array<i64: 1>, scalar_prefetch = 0 : i64, scratch_operands = 0 : i64, tpu.core_type = #tpu.core_type<tc>, window_params = [{transform_indices = @transform_0, window_bounds = array<i64: 16, 128>}, {pipeline_mode = #tpu.pipeline_mode<synchronous>, transform_indices = @transform_1, window_bounds = array<i64: 1, 128>}, {transform_indices = @transform_2, window_bounds = array<i64: 16, 128>}]} {
    %c0 = arith.constant 0 : index
    %c0_0 = arith.constant 0 : index
    %0 = vector.load %arg1[%c0, %c0_0] : memref<16x128xf32, #tpu.memory_space<vmem>>, vector<16x128xf32>
    %1 = arith.mulf %0, %0 : vector<16x128xf32>
    %cst = arith.constant dense<0.000000e+00> : vector<16xf32>
    %2 = vector.multi_reduction <add>, %1, %cst [1] : vector<16x128xf32> to vector<16xf32>
    %3 = vector.shape_cast %2 : vector<16xf32> to vector<16x1xf32>
    %cst_1 = arith.constant 3.125000e-02 : f32
    %4 = vector.broadcast %cst_1 : f32 to vector<16x1xf32>
    %5 = arith.mulf %3, %4 : vector<16x1xf32>
    %cst_2 = arith.constant 9.99999997E-7 : f32
    %6 = vector.broadcast %cst_2 : f32 to vector<16x1xf32>
    %7 = arith.addf %5, %6 : vector<16x1xf32>
    %8 = math.rsqrt %7 : vector<16x1xf32>
    %9 = vector.broadcast %8 : vector<16x1xf32> to vector<16x128xf32>
    %10 = arith.mulf %0, %9 : vector<16x128xf32>
    %c0_3 = arith.constant 0 : index
    %c0_4 = arith.constant 0 : index
    %11 = vector.load %arg2[%c0_3, %c0_4] : memref<1x128xf32, #tpu.memory_space<vmem>>, vector<1x128xf32>
    %12 = vector.broadcast %11 : vector<1x128xf32> to vector<16x128xf32>
    %13 = arith.mulf %10, %12 : vector<16x128xf32>
    %c0_5 = arith.constant 0 : index
    %c0_6 = arith.constant 0 : index
    %14 = vector.load %arg3[%c0_5, %c0_6] : memref<16x128xf32, #tpu.memory_space<vmem>>, vector<16x128xf32>
    tpu.vector_store %arg3[%c0_5, %c0_6], %13 {strides = array<i32>} : memref<16x128xf32, #tpu.memory_space<vmem>>, vector<16x128xf32>,
    return
  }
  func.func @transform_0(%arg0: i32) -> (i32, i32) {
    %c0_i32 = arith.constant 0 : i32
    %c0_i32_0 = arith.constant 0 : i32
    return %arg0, %c0_i32 : i32, i32
  }
  func.func @transform_1(%arg0: i32) -> (i32, i32) {
    %c0_i32 = arith.constant 0 : i32
    %c0_i32_0 = arith.constant 0 : i32
    %c0_i32_1 = arith.constant 0 : i32
    return %c0_i32, %c0_i32_0 : i32, i32
  }
  func.func @transform_2(%arg0: i32) -> (i32, i32) {
    %c0_i32 = arith.constant 0 : i32
    %c0_i32_0 = arith.constant 0 : i32
    return %arg0, %c0_i32 : i32, i32
  }
}

</mosaic_0001>

<bundles_post_ra>
// kernel: tpu_custom_call.1
= control target key start
LH: loop header
LB: loop body
LE: loop exit
PB: predicated region body
PF: predicated region fallthrough
CT: control target
= control target key end

     0   :  { %7 = vsyncpa [#allocation3], 0  ;;  %s227_s0 = inlined_call_operand.hbm [shape: f32[16,128], index: 0, kind: input, shape index: {}]   ;;  %s228_s1 = inlined_call_operand.hbm [shape: f32[1,128], index: 1, kind: input, shape index: {}]   ;;  %s229_s2 = inlined_call_operand.hbm [shape: f32[16,128], index: 2, kind: output, shape index: {}]  }
   0x1   :  { %8 = vsyncpa [#allocation6], 0 }
   0x2   :  { %9 = vsyncpa [#allocation4], 0  ;;  %s14_s11 = sshll.u32 %s227_s0, 4  ;;  %s192_s12 = smov [#allocation2]   ;;  %s15_s11 = int_to_ptr.hbm [resolvable:$true] %s14_s11 }
   0x3   :  { %s16_s13 = sshll.u32 %s192_s12, 4  ;;  %s28_s16 = sshll.u32 %s228_s1, 4  ;;  %s17_s13 = int_to_ptr.vmem [resolvable:$true] %s16_s13  ;;  %s29_s16 = int_to_ptr.hbm [resolvable:$true] %s28_s16 }
   0x4   :  { %s193_s17 = smov 128   ;;  %s194_s18 = smov 8  }
   0x5   :  { %22 = dma.hbm_to_vmem [thread:$0]  %s15_s11, 256, %s17_s13, [#allocation3], %s193_s17, %s193_s17, %s194_s18  }
   0x6   :  { %s195_s19 = smov [#allocation5]  }
   0x7   :  { %s30_s20 = sshll.u32 %s195_s19, 4  ;;  %s31_s20 = int_to_ptr.vmem [resolvable:$true] %s30_s20 }
   0x8   :  { %33 = dma.hbm_to_vmem [thread:$0]  %s29_s16, 16, %s31_s20, [#allocation6]  }
   0x9   :  { %186 = dma.done.wait [#allocation3], 256  }
   0xa   :  { %187 = vsyncadd [#allocation3], 4294967040 }
   0xb   :  { %188 = dma.done.wait [#allocation6], 16  }
   0xc   :  { %189 = vsyncadd [#allocation6], 4294967280  ;;  %v42_v0 = vld [vmem:[#allocation2] sm:$0xff]  ;;  %v43_v2 = vld [vmem:[#allocation2 + $0x8] sm:$0xff]  ;;  %s196_s0 = smov [#allocation7]   ;;  %s90_s23 = sshll.u32 %s229_s2, 4  ;;  %s91_s23 = int_to_ptr.hbm [resolvable:$true] %s90_s23 }
   0xd   :  { %v44_v1 = vmul.f32 %v42_v0, %v42_v0  ;;  %v45_v3 = vmul.f32 %v43_v2, %v43_v2  ;;  %v109_v18 = vld [vmem:[#allocation5] ss:$0 sm:$0xff]  ;;  %s88_s1 = sshll.u32 %s196_s0, 4  ;;  %s89_s1 = int_to_ptr.vmem [resolvable:$true] %s88_s1 }
   0xf   :  { %46 = vadd.xlane.f32.xlu0 %v44_v1 }
  0x17   :  { %48 = vadd.xlane.f32.xlu0 %v45_v3 }
  0x82   :  { %v47_v4 = vpop.xlane.xlu0 %46 }
  0x83   :  { %v50_v5 = vmul.f32 0.03125, %v47_v4 }
  0x85   :  { %v52_v6 = vadd.f32 1e-06, %v50_v5 }
  0x87   :  { %110 = vrsqrt.f32 %v52_v6  ;;  %vm60_vm1 = vweird.f32 %v52_v6 }
  0x8a   :  { %v49_v7 = vpop.xlane.xlu0 %48 }
  0x8b   :  { %v51_v8 = vmul.f32 0.03125, %v49_v7 }
  0x8d   :  { %v111_v9 = vpop.eup %110  ;;  %v53_v10 = vadd.f32 1e-06, %v51_v8 }
  0x8e   :  { %v55_v11 = vmul.f32 %v111_v9, %v52_v6  ;;  %vm61_vm0 = vweird.f32 %v111_v9 }
  0x8f   :  { %112 = vrsqrt.f32 %v53_v10  ;;  %vm62_vm2 = vmor %vm60_vm1, %vm61_vm0  ;;  %vm70_vm4 = vweird.f32 %v53_v10 }
  0x90   :  { %v56_v12 = vmul.f32 %v111_v9, %v55_v11 }
  0x92   :  { %v57_v13 = vmul.f32 0.5, %v56_v12 }
  0x94   :  { %v58_v14 = vsub.f32 1.5, %v57_v13 }
  0x95   :  { %v113_v15 = vpop.eup %112 }
  0x96   :  { %v59_v16 = vmul.f32 %v111_v9, %v58_v14  ;;  %v65_v17 = vmul.f32 %v113_v15, %v53_v10  ;;  %vm71_vm3 = vweird.f32 %v113_v15 }
  0x97   :  { %vm72_vm5 = vmor %vm70_vm4, %vm71_vm3 }
  0x98   :  { %v63_v19 = vsel %vm62_vm2, %v111_v9, %v59_v16  ;;  %v66_v20 = vmul.f32 %v113_v15, %v65_v17 }
  0x99   :  { %v74_v21 = vmul.f32 %v63_v19, %v42_v0 }
  0x9a   :  { %v67_v22 = vmul.f32 0.5, %v66_v20 }
  0x9b   :  { %v80_v23 = vmul.f32 %v109_v18, %v74_v21 }
  0x9c   :  { %v68_v24 = vsub.f32 1.5, %v67_v22 }
  0x9d   :  { %82 = vst [vmem:[#allocation7] sm:$0xff] %v80_v23 }
  0x9e   :  { %v69_v25 = vmul.f32 %v113_v15, %v68_v24 }
  0xa0   :  { %v73_v26 = vsel %vm72_vm5, %v113_v15, %v69_v25 }
  0xa1   :  { %v75_v27 = vmul.f32 %v73_v26, %v43_v2 }
  0xa3   :  { %v81_v28 = vmul.f32 %v109_v18, %v75_v27 }
  0xa5   :  { %83 = vst [vmem:[#allocation7 + $0x8] sm:$0xff] %v81_v28 }
  0xa6   :  { %96 = dma.vmem_to_hbm [thread:$0]  %s89_s1, 256, %s91_s23, [#allocation4], %s193_s17, %s193_s17, %s194_s18  }
  0xa7   :  { %190 = dma.done.wait [#allocation4], 256  }
  0xa8   :  { %191 = vsyncadd [#allocation4], 4294967040 }
  0xa9   :  { %101 = vsyncpa [#allocation3], 1 }
  0xaa   :  { %102 = vsyncpa [#allocation6], 1 }
  0xab   :  { %103 = vsyncpa [#allocation4], 1 }

</bundles_post_ra>
